<compile_context>
chip_gen: v7x
topology: tpu7x:2x2x1
jax: 0.10.0
libtpu: 0.0.40
codegen_flags: <defaults>
</compile_context>

<pallas_src>
import jax
import jax.numpy as jnp
from jax import lax
from jax.experimental import pallas as pl
from jax.experimental.pallas import tpu as pltpu

# ---- synthetic config (mirrors conf.*) -------------------------------------
VOCAB_SZ = 50       # conf.vocab_sz
WORD_DIM = 32       # conf.word_dimension
ASPECT_DIM = 16     # conf.aspect_dimension
NUM_NEG = 2         # conf.num_negative_reviews
LR_LAMBDA = 0.1     # conf.lr_lambda
EPS = 1e-12         # F.normalize default eps

# MXU operand dtype: bf16 is native on v6e/v7x (fine on v5e's MXU too); the 0/1
# chunk-sum matrices are exact in bf16.  Use jnp.float32 for strict parity.
MXU_DTYPE = jnp.bfloat16

# ---- packed-parameter layout (rows are 8-aligned per section) --------------
_D, _A = WORD_DIM, ASPECT_DIM
ROW_M = 0                    # transform_M.weight      (D, D)
ROW_W = _D                   # transform_W.weight.T    (D, A)
ROW_B = 2 * _D               # transform_W.bias        (1, A)
ROW_T = 2 * _D + 8           # transform_T.weight.T    (A, D)
P_ROWS = ROW_T + _A          # 88  (multiple of 8)
P_COLS = _D                  # 32

MASK_COLS = 128              # lane-aligned column block of the masks buffer


def _lane_tile(x, reps):
    """jnp.tile(x, (1, reps)) realized as lane concatenation (no reshapes)."""
    while reps > 1 and reps % 2 == 0:
        x = jnp.concatenate([x, x], axis=-1)
        reps //= 2
    if reps > 1:
        x = jnp.concatenate([x] * reps, axis=-1)
    return x


def abae_kernel(ids_ref, y_s_ref, z_n_ref, emb_ref, params_ref, masks_ref,
                out_loss_ref):
    f32 = jnp.float32
    TB, S = ids_ref.shape
    D = y_s_ref.shape[1]
    SD = S * D
    V = emb_ref.shape[0]
    A = ASPECT_DIM
    NN = z_n_ref.shape[1] // D

    # ---- resident constants (DMA'd once: index_map -> (0, 0) over the grid) --
    sum_dx = masks_ref[0:SD, 0:S]          # (SD, S)  [k // D == s]
    sum_zs = masks_ref[SD:2 * SD, 0:D]     # (SD, D)  [k // S == j]
    m_w = params_ref[ROW_M:ROW_M + D, 0:D]     # transform_M.weight    (D, D)
    w_t = params_ref[ROW_W:ROW_W + D, 0:A]     # transform_W.weight.T  (D, A)
    w_b = params_ref[ROW_B:ROW_B + 1, 0:A]     # transform_W.bias      (1, A)
    t_t = params_ref[ROW_T:ROW_T + A, 0:D]     # transform_T.weight.T  (A, D)

    def mxu_dot(a, b):
        # bf16 operands, f32 accumulation (v6e/v7x native; fine on v5e MXU).
        return jnp.dot(a.astype(MXU_DTYPE), b.astype(MXU_DTYPE),
                       preferred_element_type=f32)

    # ---- in-kernel embedding gather (no e_w HBM round trip) -----------------
    # e_w[b, s*D:(s+1)*D] = emb[w[b, s], :]  -> the row-major (B, S, D) slab.
    # One-hot row selection per position; kept in f32 so table values are not
    # rounded (ids < 2^24 are exact in f32).
    # TODO(synk): at production vocab/seq sizes replace this with a
    # scalar-prefetched pl.Element row gather (O(S) DMA rows, no O(V) one-hot).
    ids_f = ids_ref[...].astype(f32)                               # (TB, S)
    emb = emb_ref[...]                                             # (V, D)
    v_iota = lax.broadcasted_iota(jnp.int32, (TB, V), 1).astype(f32)
    chunks = []
    for s in range(S):                                             # static
        oh = (ids_f[:, s:s + 1] == v_iota).astype(f32)             # (TB, V)
        chunks.append(jnp.dot(oh, emb, preferred_element_type=f32))  # (TB, D)
    e_w = jnp.concatenate(chunks, axis=1)                          # (TB, SD)

    y_s = y_s_ref[...]                                             # (TB, D)

    # -- dx = matmul(transform_M(e_w), y_s[:, :, None]) ------------------------
    # Folded: dx[b, s] = e_w[b, s, :] . (y_s[b] @ M)
    q = mxu_dot(y_s, m_w)                                          # (TB, D)
    q_big = _lane_tile(q, S)                                       # (TB, SD) lane copies (no MXU)
    dx = mxu_dot(e_w * q_big, sum_dx)                              # (TB, S)

    # ax = softmax(dx, dim=1) over the sequence
    ex = jnp.exp(dx - jnp.max(dx, axis=1, keepdims=True))
    ax = ex * pl.reciprocal(jnp.sum(ex, axis=1, keepdims=True), approx=True)

    # z_s = matmul(e_w.view(B, D, S), ax[:, :, None])  -- torch's raw .view()
    # memory reinterpretation: z_s[b, j] = sum_t e_w_flat[b, j*S + t] * ax[b, t]
    ax_big = _lane_tile(ax, D)                                     # (TB, SD)
    z_s = mxu_dot(e_w * ax_big, sum_zs)                            # (TB, D)

    # p_t = softmax(transform_W(z_s), dim=1)
    logits = mxu_dot(z_s, w_t) + w_b                               # (TB, A)
    el = jnp.exp(logits - jnp.max(logits, axis=1, keepdims=True))
    p_t = el * pl.reciprocal(jnp.sum(el, axis=1, keepdims=True), approx=True)

    # r_s = transform_T(p_t)
    r_s = mxu_dot(p_t, t_t)                                        # (TB, D)

    def l2n(x):
        ss = jnp.sum(x * x, axis=1, keepdims=True)
        # x / max(||x||, EPS)  ==  x * rsqrt(max(||x||^2, EPS^2))   (EUP rsqrt)
        return x * lax.rsqrt(jnp.maximum(ss, EPS * EPS))

    r_n = l2n(r_s)
    c1 = jnp.sum(r_n * l2n(z_s), axis=1, keepdims=True)            # (TB, 1)

    z_n = z_n_ref[...]                                             # (TB, NN*D)
    c2_cols = []
    for n in range(NN):                                            # static
        zc = z_n[:, n * D:(n + 1) * D]                             # (TB, D)
        c2_cols.append(jnp.sum(l2n(zc) * r_n, axis=1, keepdims=True))
    c2 = jnp.concatenate(c2_cols, axis=1)                          # (TB, NN)

    # MarginRankingLoss(margin=1, y=+1, reduction='none'): max(0, c2 - c1 + 1)
    out_loss_ref[...] = jnp.maximum(c2 - c1 + 1.0, 0.0)


@jax.jit
def abae_forward(w, y_s, z_n, emb, m_w, w_w, w_b, t_w):
    """abae.forward:  w (B,S) ids, y_s (B,D), z_n (B*NN, D); params as arrays.

    Returns (out_loss (B*NN,), lr_lambda * U_loss + J_loss)."""
    B, S = w.shape
    V, D = emb.shape
    A = t_w.shape[1]
    NN = z_n.shape[0] // B
    SD = S * D

    # ---- pack the tiny parameters into one constant buffer (one DMA) --------
    params = jnp.zeros((P_ROWS, P_COLS), jnp.float32)
    params = params.at[ROW_M:ROW_M + D, :D].set(m_w)        # transform_M.weight
    params = params.at[ROW_W:ROW_W + D, :A].set(w_w.T)      # transform_W.weight.T
    params = params.at[ROW_B, :A].set(w_b)                  # transform_W.bias
    params = params.at[ROW_T:ROW_T + A, :D].set(t_w.T)      # transform_T.weight.T

    # ---- constant 0/1 chunk-sum matrices (hoisted out of the kernel body) ---
    k = jnp.arange(SD)
    sum_dx = (k[:, None] // D == jnp.arange(S)[None, :]).astype(jnp.float32)
    sum_zs = (k[:, None] // S == jnp.arange(D)[None, :]).astype(jnp.float32)
    masks = jnp.zeros((2 * SD, MASK_COLS), jnp.float32)
    masks = masks.at[0:SD, 0:S].set(sum_dx)
    masks = masks.at[SD:2 * SD, 0:D].set(sum_zs)

    # ---- batch-tiled grid ----------------------------------------------------
    # NOTE(scale): shrink B_TILE so double-buffered blocks fit v7x's 64 MiB
    # VMEM and set vmem_limit_bytes; the axis stays "parallel" (2 TCs on v7x).
    B_TILE = B
    grid = (B // B_TILE,)

    row = lambda shape: pl.BlockSpec(shape, lambda i: (i, 0))
    const = lambda shape: pl.BlockSpec(shape, lambda i: (0, 0))   # fetched once

    out_loss = pl.pallas_call(
        abae_kernel,
        out_shape=jax.ShapeDtypeStruct((B, NN), jnp.float32),
        grid=grid,
        in_specs=[row((B_TILE, S)),            # word ids (int32)
                  row((B_TILE, D)),            # y_s
                  row((B_TILE, NN * D)),       # z_n, lane-dense flat slab
                  const((V, D)),               # embedding table (VMEM resident)
                  const((P_ROWS, P_COLS)),     # packed parameters
                  const((2 * SD, MASK_COLS))], # packed chunk-sum constants
        out_specs=row((B_TILE, NN)),
        compiler_params=pltpu.CompilerParams(
            dimension_semantics=("parallel",)),
    )(w.astype(jnp.int32), y_s, z_n.reshape(B, NN * D), emb, params, masks)

    # ---- batch-independent epilogue (hoisted off the per-step path) ---------
    j_loss = jnp.mean(out_loss)
    # U_loss: columns of transform_T.weight L2-normalized, gram vs identity.
    t_norm = t_w / jnp.maximum(
        jnp.sqrt(jnp.sum(t_w * t_w, axis=0, keepdims=True)), EPS)
    u = t_norm.T @ t_norm
    u_loss = jnp.mean((u - jnp.eye(A, dtype=jnp.float32)) ** 2)

    return out_loss.reshape(-1), LR_LAMBDA * u_loss + j_loss


if __name__ == "__main__":
    key = jax.random.PRNGKey(0)
    ks = jax.random.split(key, 7)
    B, S = 2, 8

    # deterministic synthetic inputs/parameters (shapes follow module __init__)
    w = jax.random.randint(ks[0], (B, S), 0, VOCAB_SZ)                        # word ids
    emb = 0.1 * jax.random.normal(ks[1], (VOCAB_SZ, WORD_DIM), jnp.float32)   # frozen table
    y_s = jnp.mean(emb[w], axis=1)                                            # (B, D)
    z_n = 0.1 * jax.random.normal(ks[2], (B * NUM_NEG, WORD_DIM), jnp.float32)
    m_w = 0.1 * jax.random.normal(ks[3], (WORD_DIM, WORD_DIM), jnp.float32)   # transform_M.weight
    w_w = 0.1 * jax.random.normal(ks[4], (ASPECT_DIM, WORD_DIM), jnp.float32) # transform_W.weight
    w_b = 0.1 * jax.random.normal(ks[5], (ASPECT_DIM,), jnp.float32)          # transform_W.bias
    t_w = 0.1 * jax.random.normal(ks[6], (WORD_DIM, ASPECT_DIM), jnp.float32) # transform_T.weight

    out_loss, total_loss = abae_forward(w, y_s, z_n, emb, m_w, w_w, w_b, t_w)
    jax.block_until_ready((out_loss, total_loss))
    print("KERNEL_OK")
</pallas_src>

<mosaic_0001>
module attributes {stable_mosaic.version = 11 : i64} {
  func.func @abae_kernel(%arg0: i32, %arg1: memref<2x8xi32, #tpu.memory_space<vmem>>, %arg2: memref<2x32xf32, #tpu.memory_space<vmem>>, %arg3: memref<2x64xf32, #tpu.memory_space<vmem>>, %arg4: memref<50x32xf32, #tpu.memory_space<vmem>>, %arg5: memref<88x32xf32, #tpu.memory_space<vmem>>, %arg6: memref<512x128xf32, #tpu.memory_space<vmem>>, %arg7: memref<2x2xf32, #tpu.memory_space<vmem>>) attributes {dimension_semantics = [#tpu.dimension_semantics<parallel>], iteration_bounds = array<i64: 1>, scalar_prefetch = 0 : i64, scratch_operands = 0 : i64, tpu.core_type = #tpu.core_type<tc>, window_params = [{transform_indices = @transform_0, window_bounds = array<i64: 2, 8>}, {transform_indices = @transform_1, window_bounds = array<i64: 2, 32>}, {transform_indices = @transform_2, window_bounds = array<i64: 2, 64>}, {pipeline_mode = #tpu.pipeline_mode<synchronous>, transform_indices = @transform_3, window_bounds = array<i64: 50, 32>}, {pipeline_mode = #tpu.pipeline_mode<synchronous>, transform_indices = @transform_4, window_bounds = array<i64: 88, 32>}, {pipeline_mode = #tpu.pipeline_mode<synchronous>, transform_indices = @transform_5, window_bounds = array<i64: 512, 128>}, {transform_indices = @transform_6, window_bounds = array<i64: 2, 2>}]} {
    %c0 = arith.constant 0 : index
    %c0_0 = arith.constant 0 : index
    %0 = vector.load %arg6[%c0, %c0_0] : memref<512x128xf32, #tpu.memory_space<vmem>>, vector<256x8xf32>
    %c256 = arith.constant 256 : index
    %c0_1 = arith.constant 0 : index
    %1 = vector.load %arg6[%c256, %c0_1] : memref<512x128xf32, #tpu.memory_space<vmem>>, vector<256x32xf32>
    %c0_2 = arith.constant 0 : index
    %c0_3 = arith.constant 0 : index
    %2 = vector.load %arg5[%c0_2, %c0_3] : memref<88x32xf32, #tpu.memory_space<vmem>>, vector<32x32xf32>
    %c32 = arith.constant 32 : index
    %c0_4 = arith.constant 0 : index
    %3 = vector.load %arg5[%c32, %c0_4] : memref<88x32xf32, #tpu.memory_space<vmem>>, vector<32x16xf32>
    %c64 = arith.constant 64 : index
    %c0_5 = arith.constant 0 : index
    %4 = vector.load %arg5[%c64, %c0_5] : memref<88x32xf32, #tpu.memory_space<vmem>>, vector<1x16xf32>
    %c72 = arith.constant 72 : index
    %c0_6 = arith.constant 0 : index
    %5 = vector.load %arg5[%c72, %c0_6] : memref<88x32xf32, #tpu.memory_space<vmem>>, vector<16x32xf32>
    %c0_7 = arith.constant 0 : index
    %c0_8 = arith.constant 0 : index
    %6 = vector.load %arg1[%c0_7, %c0_8] : memref<2x8xi32, #tpu.memory_space<vmem>>, vector<2x8xi32>
    %7 = arith.sitofp %6 : vector<2x8xi32> to vector<2x8xf32>
    %c0_9 = arith.constant 0 : index
    %c0_10 = arith.constant 0 : index
    %8 = vector.load %arg4[%c0_9, %c0_10] : memref<50x32xf32, #tpu.memory_space<vmem>>, vector<50x32xf32>
    %9 = tpu.iota {dimensions = array<i32: 1>} : vector<2x50xi32>
    %10 = arith.sitofp %9 : vector<2x50xi32> to vector<2x50xf32>
    %11 = vector.extract_strided_slice %7 {offsets = [0, 0], sizes = [2, 1], strides = [1, 1]} : vector<2x8xf32> to vector<2x1xf32>
    %12 = vector.broadcast %11 : vector<2x1xf32> to vector<2x50xf32>
    %13 = arith.cmpf oeq, %12, %10 : vector<2x50xf32>
    %14 = arith.extui %13 : vector<2x50xi1> to vector<2x50xi32>
    %15 = arith.sitofp %14 : vector<2x50xi32> to vector<2x50xf32>
    %cst = arith.constant dense<0.000000e+00> : vector<2x32xf32>
    %16 = tpu.matmul %15, %8, %cst {dimension_numbers = #tpu.dot_dimension_numbers<[1], [0], [0], [1], [0, 0, 1, 1], [], []>} : vector<2x50xf32>, vector<50x32xf32>, vector<2x32xf32> -> vector<2x32xf32>
    %17 = vector.extract_strided_slice %7 {offsets = [0, 1], sizes = [2, 1], strides = [1, 1]} : vector<2x8xf32> to vector<2x1xf32>
    %18 = vector.broadcast %17 : vector<2x1xf32> to vector<2x50xf32>
    %19 = arith.cmpf oeq, %18, %10 : vector<2x50xf32>
    %20 = arith.extui %19 : vector<2x50xi1> to vector<2x50xi32>
    %21 = arith.sitofp %20 : vector<2x50xi32> to vector<2x50xf32>
    %cst_11 = arith.constant dense<0.000000e+00> : vector<2x32xf32>
    %22 = tpu.matmul %21, %8, %cst_11 {dimension_numbers = #tpu.dot_dimension_numbers<[1], [0], [0], [1], [0, 0, 1, 1], [], []>} : vector<2x50xf32>, vector<50x32xf32>, vector<2x32xf32> -> vector<2x32xf32>
    %23 = vector.extract_strided_slice %7 {offsets = [0, 2], sizes = [2, 1], strides = [1, 1]} : vector<2x8xf32> to vector<2x1xf32>
    %24 = vector.broadcast %23 : vector<2x1xf32> to vector<2x50xf32>
    %25 = arith.cmpf oeq, %24, %10 : vector<2x50xf32>
    %26 = arith.extui %25 : vector<2x50xi1> to vector<2x50xi32>
    %27 = arith.sitofp %26 : vector<2x50xi32> to vector<2x50xf32>
    %cst_12 = arith.constant dense<0.000000e+00> : vector<2x32xf32>
    %28 = tpu.matmul %27, %8, %cst_12 {dimension_numbers = #tpu.dot_dimension_numbers<[1], [0], [0], [1], [0, 0, 1, 1], [], []>} : vector<2x50xf32>, vector<50x32xf32>, vector<2x32xf32> -> vector<2x32xf32>
    %29 = vector.extract_strided_slice %7 {offsets = [0, 3], sizes = [2, 1], strides = [1, 1]} : vector<2x8xf32> to vector<2x1xf32>
    %30 = vector.broadcast %29 : vector<2x1xf32> to vector<2x50xf32>
    %31 = arith.cmpf oeq, %30, %10 : vector<2x50xf32>
    %32 = arith.extui %31 : vector<2x50xi1> to vector<2x50xi32>
    %33 = arith.sitofp %32 : vector<2x50xi32> to vector<2x50xf32>
    %cst_13 = arith.constant dense<0.000000e+00> : vector<2x32xf32>
    %34 = tpu.matmul %33, %8, %cst_13 {dimension_numbers = #tpu.dot_dimension_numbers<[1], [0], [0], [1], [0, 0, 1, 1], [], []>} : vector<2x50xf32>, vector<50x32xf32>, vector<2x32xf32> -> vector<2x32xf32>
    %35 = vector.extract_strided_slice %7 {offsets = [0, 4], sizes = [2, 1], strides = [1, 1]} : vector<2x8xf32> to vector<2x1xf32>
    %36 = vector.broadcast %35 : vector<2x1xf32> to vector<2x50xf32>
    %37 = arith.cmpf oeq, %36, %10 : vector<2x50xf32>
    %38 = arith.extui %37 : vector<2x50xi1> to vector<2x50xi32>
    %39 = arith.sitofp %38 : vector<2x50xi32> to vector<2x50xf32>
    %cst_14 = arith.constant dense<0.000000e+00> : vector<2x32xf32>
    %40 = tpu.matmul %39, %8, %cst_14 {dimension_numbers = #tpu.dot_dimension_numbers<[1], [0], [0], [1], [0, 0, 1, 1], [], []>} : vector<2x50xf32>, vector<50x32xf32>, vector<2x32xf32> -> vector<2x32xf32>
    %41 = vector.extract_strided_slice %7 {offsets = [0, 5], sizes = [2, 1], strides = [1, 1]} : vector<2x8xf32> to vector<2x1xf32>
    %42 = vector.broadcast %41 : vector<2x1xf32> to vector<2x50xf32>
    %43 = arith.cmpf oeq, %42, %10 : vector<2x50xf32>
    %44 = arith.extui %43 : vector<2x50xi1> to vector<2x50xi32>
    %45 = arith.sitofp %44 : vector<2x50xi32> to vector<2x50xf32>
    %cst_15 = arith.constant dense<0.000000e+00> : vector<2x32xf32>
    %46 = tpu.matmul %45, %8, %cst_15 {dimension_numbers = #tpu.dot_dimension_numbers<[1], [0], [0], [1], [0, 0, 1, 1], [], []>} : vector<2x50xf32>, vector<50x32xf32>, vector<2x32xf32> -> vector<2x32xf32>
    %47 = vector.extract_strided_slice %7 {offsets = [0, 6], sizes = [2, 1], strides = [1, 1]} : vector<2x8xf32> to vector<2x1xf32>
    %48 = vector.broadcast %47 : vector<2x1xf32> to vector<2x50xf32>
    %49 = arith.cmpf oeq, %48, %10 : vector<2x50xf32>
    %50 = arith.extui %49 : vector<2x50xi1> to vector<2x50xi32>
    %51 = arith.sitofp %50 : vector<2x50xi32> to vector<2x50xf32>
    %cst_16 = arith.constant dense<0.000000e+00> : vector<2x32xf32>
    %52 = tpu.matmul %51, %8, %cst_16 {dimension_numbers = #tpu.dot_dimension_numbers<[1], [0], [0], [1], [0, 0, 1, 1], [], []>} : vector<2x50xf32>, vector<50x32xf32>, vector<2x32xf32> -> vector<2x32xf32>
    %53 = vector.extract_strided_slice %7 {offsets = [0, 7], sizes = [2, 1], strides = [1, 1]} : vector<2x8xf32> to vector<2x1xf32>
    %54 = vector.broadcast %53 : vector<2x1xf32> to vector<2x50xf32>
    %55 = arith.cmpf oeq, %54, %10 : vector<2x50xf32>
    %56 = arith.extui %55 : vector<2x50xi1> to vector<2x50xi32>
    %57 = arith.sitofp %56 : vector<2x50xi32> to vector<2x50xf32>
    %cst_17 = arith.constant dense<0.000000e+00> : vector<2x32xf32>
    %58 = tpu.matmul %57, %8, %cst_17 {dimension_numbers = #tpu.dot_dimension_numbers<[1], [0], [0], [1], [0, 0, 1, 1], [], []>} : vector<2x50xf32>, vector<50x32xf32>, vector<2x32xf32> -> vector<2x32xf32>
    %59 = tpu.concatenate %16, %22, %28, %34, %40, %46, %52, %58 in 1 : vector<2x32xf32>, vector<2x32xf32>, vector<2x32xf32>, vector<2x32xf32>, vector<2x32xf32>, vector<2x32xf32>, vector<2x32xf32>, vector<2x32xf32> -> vector<2x256xf32>
    %c0_18 = arith.constant 0 : index
    %c0_19 = arith.constant 0 : index
    %60 = vector.load %arg2[%c0_18, %c0_19] : memref<2x32xf32, #tpu.memory_space<vmem>>, vector<2x32xf32>
    %61 = arith.truncf %60 : vector<2x32xf32> to vector<2x32xbf16>
    %62 = arith.truncf %2 : vector<32x32xf32> to vector<32x32xbf16>
    %cst_20 = arith.constant dense<0.000000e+00> : vector<2x32xf32>
    %63 = tpu.matmul %61, %62, %cst_20 {dimension_numbers = #tpu.dot_dimension_numbers<[1], [0], [0], [1], [0, 0, 1, 1], [], []>} : vector<2x32xbf16>, vector<32x32xbf16>, vector<2x32xf32> -> vector<2x32xf32>
    %64 = tpu.concatenate %63, %63 in 1 : vector<2x32xf32>, vector<2x32xf32> -> vector<2x64xf32>
    %65 = tpu.concatenate %64, %64 in 1 : vector<2x64xf32>, vector<2x64xf32> -> vector<2x128xf32>
    %66 = tpu.concatenate %65, %65 in 1 : vector<2x128xf32>, vector<2x128xf32> -> vector<2x256xf32>
    %67 = arith.mulf %59, %66 : vector<2x256xf32>
    %68 = arith.truncf %67 : vector<2x256xf32> to vector<2x256xbf16>
    %69 = arith.truncf %0 : vector<256x8xf32> to vector<256x8xbf16>
    %cst_21 = arith.constant dense<0.000000e+00> : vector<2x8xf32>
    %70 = tpu.matmul %68, %69, %cst_21 {dimension_numbers = #tpu.dot_dimension_numbers<[1], [0], [0], [1], [0, 0, 1, 1], [], []>} : vector<2x256xbf16>, vector<256x8xbf16>, vector<2x8xf32> -> vector<2x8xf32>
    %cst_22 = arith.constant dense<0xFF800000> : vector<2xf32>
    %71 = vector.multi_reduction <maximumf>, %70, %cst_22 [1] : vector<2x8xf32> to vector<2xf32>
    %72 = vector.shape_cast %71 : vector<2xf32> to vector<2x1xf32>
    %73 = vector.broadcast %72 : vector<2x1xf32> to vector<2x8xf32>
    %74 = arith.subf %70, %73 : vector<2x8xf32>
    %75 = math.exp %74 : vector<2x8xf32>
    %cst_23 = arith.constant dense<0.000000e+00> : vector<2xf32>
    %76 = vector.multi_reduction <add>, %75, %cst_23 [1] : vector<2x8xf32> to vector<2xf32>
    %77 = vector.shape_cast %76 : vector<2xf32> to vector<2x1xf32>
    %78 = tpu.reciprocal %77 {approx = true} : vector<2x1xf32> -> vector<2x1xf32>
    %79 = vector.broadcast %78 : vector<2x1xf32> to vector<2x8xf32>
    %80 = arith.mulf %75, %79 : vector<2x8xf32>
    %81 = tpu.concatenate %80, %80 in 1 : vector<2x8xf32>, vector<2x8xf32> -> vector<2x16xf32>
    %82 = tpu.concatenate %81, %81 in 1 : vector<2x16xf32>, vector<2x16xf32> -> vector<2x32xf32>
    %83 = tpu.concatenate %82, %82 in 1 : vector<2x32xf32>, vector<2x32xf32> -> vector<2x64xf32>
    %84 = tpu.concatenate %83, %83 in 1 : vector<2x64xf32>, vector<2x64xf32> -> vector<2x128xf32>
    %85 = tpu.concatenate %84, %84 in 1 : vector<2x128xf32>, vector<2x128xf32> -> vector<2x256xf32>
    %86 = arith.mulf %59, %85 : vector<2x256xf32>
    %87 = arith.truncf %86 : vector<2x256xf32> to vector<2x256xbf16>
    %88 = arith.truncf %1 : vector<256x32xf32> to vector<256x32xbf16>
    %cst_24 = arith.constant dense<0.000000e+00> : vector<2x32xf32>
    %89 = tpu.matmul %87, %88, %cst_24 {dimension_numbers = #tpu.dot_dimension_numbers<[1], [0], [0], [1], [0, 0, 1, 1], [], []>} : vector<2x256xbf16>, vector<256x32xbf16>, vector<2x32xf32> -> vector<2x32xf32>
    %90 = arith.truncf %89 : vector<2x32xf32> to vector<2x32xbf16>
    %91 = arith.truncf %3 : vector<32x16xf32> to vector<32x16xbf16>
    %cst_25 = arith.constant dense<0.000000e+00> : vector<2x16xf32>
    %92 = tpu.matmul %90, %91, %cst_25 {dimension_numbers = #tpu.dot_dimension_numbers<[1], [0], [0], [1], [0, 0, 1, 1], [], []>} : vector<2x32xbf16>, vector<32x16xbf16>, vector<2x16xf32> -> vector<2x16xf32>
    %93 = vector.broadcast %4 : vector<1x16xf32> to vector<2x16xf32>
    %94 = arith.addf %92, %93 : vector<2x16xf32>
    %cst_26 = arith.constant dense<0xFF800000> : vector<2xf32>
    %95 = vector.multi_reduction <maximumf>, %94, %cst_26 [1] : vector<2x16xf32> to vector<2xf32>
    %96 = vector.shape_cast %95 : vector<2xf32> to vector<2x1xf32>
    %97 = vector.broadcast %96 : vector<2x1xf32> to vector<2x16xf32>
    %98 = arith.subf %94, %97 : vector<2x16xf32>
    %99 = math.exp %98 : vector<2x16xf32>
    %cst_27 = arith.constant dense<0.000000e+00> : vector<2xf32>
    %100 = vector.multi_reduction <add>, %99, %cst_27 [1] : vector<2x16xf32> to vector<2xf32>
    %101 = vector.shape_cast %100 : vector<2xf32> to vector<2x1xf32>
    %102 = tpu.reciprocal %101 {approx = true} : vector<2x1xf32> -> vector<2x1xf32>
    %103 = vector.broadcast %102 : vector<2x1xf32> to vector<2x16xf32>
    %104 = arith.mulf %99, %103 : vector<2x16xf32>
    %105 = arith.truncf %104 : vector<2x16xf32> to vector<2x16xbf16>
    %106 = arith.truncf %5 : vector<16x32xf32> to vector<16x32xbf16>
    %cst_28 = arith.constant dense<0.000000e+00> : vector<2x32xf32>
    %107 = tpu.matmul %105, %106, %cst_28 {dimension_numbers = #tpu.dot_dimension_numbers<[1], [0], [0], [1], [0, 0, 1, 1], [], []>} : vector<2x16xbf16>, vector<16x32xbf16>, vector<2x32xf32> -> vector<2x32xf32>
    %108 = arith.mulf %107, %107 : vector<2x32xf32>
    %cst_29 = arith.constant dense<0.000000e+00> : vector<2xf32>
    %109 = vector.multi_reduction <add>, %108, %cst_29 [1] : vector<2x32xf32> to vector<2xf32>
    %110 = vector.shape_cast %109 : vector<2xf32> to vector<2x1xf32>
    %cst_30 = arith.constant 1.000000e-24 : f32
    %111 = vector.broadcast %cst_30 : f32 to vector<2x1xf32>
    %112 = arith.maximumf %110, %111 : vector<2x1xf32>
    %113 = math.rsqrt %112 : vector<2x1xf32>
    %114 = vector.broadcast %113 : vector<2x1xf32> to vector<2x32xf32>
    %115 = arith.mulf %107, %114 : vector<2x32xf32>
    %116 = arith.mulf %89, %89 : vector<2x32xf32>
    %cst_31 = arith.constant dense<0.000000e+00> : vector<2xf32>
    %117 = vector.multi_reduction <add>, %116, %cst_31 [1] : vector<2x32xf32> to vector<2xf32>
    %118 = vector.shape_cast %117 : vector<2xf32> to vector<2x1xf32>
    %cst_32 = arith.constant 1.000000e-24 : f32
    %119 = vector.broadcast %cst_32 : f32 to vector<2x1xf32>
    %120 = arith.maximumf %118, %119 : vector<2x1xf32>
    %121 = math.rsqrt %120 : vector<2x1xf32>
    %122 = vector.broadcast %121 : vector<2x1xf32> to vector<2x32xf32>
    %123 = arith.mulf %89, %122 : vector<2x32xf32>
    %124 = arith.mulf %115, %123 : vector<2x32xf32>
    %cst_33 = arith.constant dense<0.000000e+00> : vector<2xf32>
    %125 = vector.multi_reduction <add>, %124, %cst_33 [1] : vector<2x32xf32> to vector<2xf32>
    %126 = vector.shape_cast %125 : vector<2xf32> to vector<2x1xf32>
    %c0_34 = arith.constant 0 : index
    %c0_35 = arith.constant 0 : index
    %127 = vector.load %arg3[%c0_34, %c0_35] : memref<2x64xf32, #tpu.memory_space<vmem>>, vector<2x64xf32>
    %128 = vector.extract_strided_slice %127 {offsets = [0, 0], sizes = [2, 32], strides = [1, 1]} : vector<2x64xf32> to vector<2x32xf32>
    %129 = arith.mulf %128, %128 : vector<2x32xf32>
    %cst_36 = arith.constant dense<0.000000e+00> : vector<2xf32>
    %130 = vector.multi_reduction <add>, %129, %cst_36 [1] : vector<2x32xf32> to vector<2xf32>
    %131 = vector.shape_cast %130 : vector<2xf32> to vector<2x1xf32>
    %cst_37 = arith.constant 1.000000e-24 : f32
    %132 = vector.broadcast %cst_37 : f32 to vector<2x1xf32>
    %133 = arith.maximumf %131, %132 : vector<2x1xf32>
    %134 = math.rsqrt %133 : vector<2x1xf32>
    %135 = vector.broadcast %134 : vector<2x1xf32> to vector<2x32xf32>
    %136 = arith.mulf %128, %135 : vector<2x32xf32>
    %137 = arith.mulf %136, %115 : vector<2x32xf32>
    %cst_38 = arith.constant dense<0.000000e+00> : vector<2xf32>
    %138 = vector.multi_reduction <add>, %137, %cst_38 [1] : vector<2x32xf32> to vector<2xf32>
    %139 = vector.shape_cast %138 : vector<2xf32> to vector<2x1xf32>
    %140 = vector.extract_strided_slice %127 {offsets = [0, 32], sizes = [2, 32], strides = [1, 1]} : vector<2x64xf32> to vector<2x32xf32>
    %141 = arith.mulf %140, %140 : vector<2x32xf32>
    %cst_39 = arith.constant dense<0.000000e+00> : vector<2xf32>
    %142 = vector.multi_reduction <add>, %141, %cst_39 [1] : vector<2x32xf32> to vector<2xf32>
    %143 = vector.shape_cast %142 : vector<2xf32> to vector<2x1xf32>
    %cst_40 = arith.constant 1.000000e-24 : f32
    %144 = vector.broadcast %cst_40 : f32 to vector<2x1xf32>
    %145 = arith.maximumf %143, %144 : vector<2x1xf32>
    %146 = math.rsqrt %145 : vector<2x1xf32>
    %147 = vector.broadcast %146 : vector<2x1xf32> to vector<2x32xf32>
    %148 = arith.mulf %140, %147 : vector<2x32xf32>
    %149 = arith.mulf %148, %115 : vector<2x32xf32>
    %cst_41 = arith.constant dense<0.000000e+00> : vector<2xf32>
    %150 = vector.multi_reduction <add>, %149, %cst_41 [1] : vector<2x32xf32> to vector<2xf32>
    %151 = vector.shape_cast %150 : vector<2xf32> to vector<2x1xf32>
    %152 = tpu.concatenate %139, %151 in 1 : vector<2x1xf32>, vector<2x1xf32> -> vector<2x2xf32>
    %153 = vector.broadcast %126 : vector<2x1xf32> to vector<2x2xf32>
    %154 = arith.subf %152, %153 : vector<2x2xf32>
    %cst_42 = arith.constant 1.000000e+00 : f32
    %155 = vector.broadcast %cst_42 : f32 to vector<2x2xf32>
    %156 = arith.addf %154, %155 : vector<2x2xf32>
    %cst_43 = arith.constant 0.000000e+00 : f32
    %157 = vector.broadcast %cst_43 : f32 to vector<2x2xf32>
    %158 = arith.maximumf %156, %157 : vector<2x2xf32>
    %c0_44 = arith.constant 0 : index
    %c0_45 = arith.constant 0 : index
    %159 = vector.load %arg7[%c0_44, %c0_45] : memref<2x2xf32, #tpu.memory_space<vmem>>, vector<2x2xf32>
    tpu.vector_store %arg7[%c0_44, %c0_45], %158 {strides = array<i32>} : memref<2x2xf32, #tpu.memory_space<vmem>>, vector<2x2xf32>,
    return
  }
  func.func @transform_0(%arg0: i32) -> (i32, i32) {
    %c0_i32 = arith.constant 0 : i32
    %c0_i32_0 = arith.constant 0 : i32
    return %arg0, %c0_i32 : i32, i32
  }
  func.func @transform_1(%arg0: i32) -> (i32, i32) {
    %c0_i32 = arith.constant 0 : i32
    %c0_i32_0 = arith.constant 0 : i32
    return %arg0, %c0_i32 : i32, i32
  }
  func.func @transform_2(%arg0: i32) -> (i32, i32) {
    %c0_i32 = arith.constant 0 : i32
    %c0_i32_0 = arith.constant 0 : i32
    return %arg0, %c0_i32 : i32, i32
  }
  func.func @transform_3(%arg0: i32) -> (i32, i32) {
    %c0_i32 = arith.constant 0 : i32
    %c0_i32_0 = arith.constant 0 : i32
    %c0_i32_1 = arith.constant 0 : i32
    return %c0_i32, %c0_i32_0 : i32, i32
  }
  func.func @transform_4(%arg0: i32) -> (i32, i32) {
    %c0_i32 = arith.constant 0 : i32
    %c0_i32_0 = arith.constant 0 : i32
    %c0_i32_1 = arith.constant 0 : i32
    return %c0_i32, %c0_i32_0 : i32, i32
  }
  func.func @transform_5(%arg0: i32) -> (i32, i32) {
    %c0_i32 = arith.constant 0 : i32
    %c0_i32_0 = arith.constant 0 : i32
    %c0_i32_1 = arith.constant 0 : i32
    return %c0_i32, %c0_i32_0 : i32, i32
  }
  func.func @transform_6(%arg0: i32) -> (i32, i32) {
    %c0_i32 = arith.constant 0 : i32
    %c0_i32_0 = arith.constant 0 : i32
    return %arg0, %c0_i32 : i32, i32
  }
}

</mosaic_0001>

<bundles_post_ra>
// kernel: abae_forward.1
= control target key start
LH: loop header
LB: loop body
LE: loop exit
PB: predicated region body
PF: predicated region fallthrough
CT: control target
= control target key end

     0   :  { %v1587_v0 = vmov 4   ;;  %v1588_v1 = vmov 0   ;;  %v1589_v6 = vmov 0.0|0.0   ;;  %vm1590_vm0 = vmmov 0   ;;  %s1599_s21 = smov 64   ;;  %s1600_s16 = smov 96   ;;  %s2089_s0 = inlined_call_operand.vmem [shape: s32[2,8], index: 0, kind: input, shape index: {}]   ;;  %s2090_s3 = inlined_call_operand.vmem [shape: f32[50,32], index: 3, kind: input, shape index: {}]   ;;  %s2091_s4 = inlined_call_operand.vmem [shape: f32[88,32], index: 4, kind: input, shape index: {}]   ;;  %s2092_s1 = inlined_call_operand.vmem [shape: f32[2,32], index: 1, kind: input, shape index: {}]   ;;  %s2093_s5 = inlined_call_operand.vmem [shape: f32[512,128], index: 5, kind: input, shape index: {}]   ;;  %s2094_s2 = inlined_call_operand.vmem [shape: f32[2,64], index: 2, kind: input, shape index: {}]   ;;  %s2095_s6 = inlined_call_operand.vmem [shape: f32[2,2], index: 6, kind: output, shape index: {}]  }
   0x1   :  { %1564 = vset.pattern.permute.xlu1 %v1587_v0  ;;  %1562 = vset.pattern.permute.xlu0 %v1588_v1  ;;  %v99_v2 = vld [vmem:[%s2089_s0] sm:$0x3]  ;;  %v102_v5 = vld [vmem:[%s2090_s3 + $0x8] sm:$0xff]  ;;  %v103_v8 = vld [vmem:[%s2090_s3 + $0x10] sm:$0xff]  ;;  %v1591_v11 = vmov 0.0   ;;  %v1592_v12 = vmov 6   ;;  %v108_v22 = vlaneseq }
   0x2   :  { %v100_v3 = vcvt.s32.f32 %v99_v2  ;;  %v101_v4 = vld [vmem:[%s2090_s3] sm:$0xff]  ;;  %1474 = vmatprep.subr.bf16.mxu0 %v1589_v6  ;;  %v104_v9 = vld [vmem:[%s2090_s3 + $0x18] sm:$0xff]  ;;  %1483 = vmatprep.subr.bf16.mxu1 %v1589_v6  ;;  %v1593_v13 = vmov 2   ;;  %v106_v15 = vld [vmem:[%s2090_s3 + $0x28] sm:$0xff]  ;;  %v1594_v17 = vmov 1   ;;  %v1595_v18 = vmov 3  }
   0x3   :  { %v1648_v7 = vpack.c.bf16 %v102_v5, %v101_v4  ;;  %v1660_v10 = vpack.c.bf16 %v104_v9, %v103_v8  ;;  %1330 = vmatprep.mubr.msk.f32.mxu0 %vm1590_vm0, %v1591_v11  ;;  %1347 = vmatprep.mubr.msk.f32.mxu1 %vm1590_vm0, %v1591_v11  ;;  %v105_v14 = vld [vmem:[%s2090_s3 + $0x20] sm:$0xff]  ;;  %v1685_v19 = vld [vmem:[%s2090_s3 + $0x30] sm:$0x3]  ;;  %vm123_vm1 = vcmask 1041408   ;;  %v1596_v20 = vmov 5   ;;  %v89_v39 = vld [vmem:[%s2091_s4 + $0x8] sm:$0xff] }
   0x4   :  { %438 = vperm.xlu1 %1564, %v100_v3   ;;  %113 = vperm.xlu0 %1562, %v100_v3   ;;  %v1676_v16 = vpack.c.bf16 %v106_v15, %v105_v14  ;;  %v1597_v21 = vmov 7   ;;  %v109_v23 = vand.u32 127, %v108_v22  ;;  %vm119_vm2 = vcmask 408576   ;;  %v88_v38 = vld [vmem:[%s2091_s4] sm:$0xff]  ;;  %v90_v42 = vld [vmem:[%s2091_s4 + $0x10] sm:$0xff]  ;;  %v91_v43 = vld [vmem:[%s2091_s4 + $0x18] sm:$0xff] }
   0x5   :  { %1476 = vmatpush3.bf16.msra.mxu0 %v1648_v7  ;;  %1485 = vmatpush3.bf16.msra.mxu1 %v1648_v7  ;;  %v792_v41 = vpack.c.bf16 %v89_v39, %v88_v38  ;;  %v793_v44 = vpack.c.bf16 %v91_v43, %v90_v42  ;;  %v790_v46 = vld [vmem:[%s2092_s1] sm:$0x3]  ;;  %vm781_vm11 = vcmask 261120   ;;  %s1598_s1 = smov 32   ;;  %v41_v0 = vld [vmem:[%s2093_s5 + $0x88] sm:$0xff]  ;;  %v42_v4 = vld [vmem:[%s2093_s5 + $0x90] sm:$0xff] }
   0x6   :  { %1477 = vmatprep.subr.bf16.mxu0 %v1589_v6  ;;  %1486 = vmatprep.subr.bf16.mxu1 %v1589_v6  ;;  %v1694_v24 = vcvt.s32.f32 %v109_v23  ;;  %v791_v47 = vpack.c.bf16 %v790_v46, %v790_v46  ;;  %v40_v63 = vld [vmem:[%s2093_s5 + $0x80] sm:$0xff]  ;;  %v43_v5 = vld [vmem:[%s2093_s5 + $0x98] sm:$0xff]  ;;  %v26_v9 = vld [vmem:[%s2093_s5 + $0x10] sm:$0xff]  ;;  %vm783_vm12 = vcmask 523264   ;;  %vm785_vm13 = vcmask 785408   ;;  %s1601_s12 = smov 8  }
   0x7   :  { %v24_v1 = vld [vmem:[%s2093_s5] sm:$0xff]  ;;  %v859_v2 = vpack.c.bf16 %v41_v0, %v40_v63  ;;  %v860_v8 = vpack.c.bf16 %v43_v5, %v42_v4  ;;  %v45_v14 = vld [vmem:[%s2093_s5 + $0xa8] sm:$0xff]  ;;  %v46_v23 = vld [vmem:[%s2093_s5 + $0xb0] sm:$0xff]  ;;  %vm907_vm14 = vcmask 58368   ;;  %vm923_vm15 = vcmask 64512   ;;  %s1602_s13 = smov 16  }
   0x8   :  { %1565 = vset.pattern.permute.xlu1 %v1592_v12  ;;  %1563 = vset.pattern.permute.xlu0 %v1593_v13  ;;  %v44_v12 = vld [vmem:[%s2093_s5 + $0xa0] sm:$0xff]  ;;  %v29_v22 = vld [vmem:[%s2093_s5 + $0x28] sm:$0xff]  ;;  %v34_v39 = vld [vmem:[%s2093_s5 + $0x50] sm:$0xff] }
   0x9   :  { %598 = vperm.xlu1 %1565, %v100_v3   ;;  %278 = vperm.xlu0 %1563, %v100_v3   ;;  %v53_v42 = vld [vmem:[%s2093_s5 + $0xe8] sm:$0xff] }
   0xa   :  { %1479 = vmatpush3.bf16.msra.mxu0 %v1660_v10  ;;  %1488 = vmatpush3.bf16.msra.mxu1 %v1660_v10  ;;  %v37_v46 = vld [vmem:[%s2093_s5 + $0x68] sm:$0xff] }
   0xb   :  { %1480 = vmatprep.subr.bf16.mxu0 %v1589_v6  ;;  %1489 = vmatprep.subr.bf16.mxu1 %v1589_v6 }
   0xd   :  { %1566 = vset.pattern.permute.xlu1 %v1594_v17  ;;  %1567 = vset.pattern.permute.xlu0 %v1595_v18 }
   0xe   :  { %198 = vperm.xlu1 %1566, %v100_v3   ;;  %358 = vperm.xlu0 %1567, %v100_v3  }
   0xf   :  { %1482 = vmatpush3.bf16.msra.mxu0 %v1676_v16  ;;  %1491 = vmatpush3.bf16.msra.mxu1 %v1676_v16 }
  0x10   :  { %1328 = vmatprep.subr.mxu0 %v1591_v11  ;;  %1345 = vmatprep.subr.mxu1 %v1591_v11 }
  0x12   :  { %1568 = vset.pattern.permute.xlu1 %v1596_v20  ;;  %1570 = vset.pattern.permute.xlu0 %v1597_v21  ;;  %v861_v20 = vpack.c.bf16 %v45_v14, %v44_v12 }
  0x13   :  { %518 = vperm.xlu1 %1568, %v100_v3   ;;  %1329 = vmatpush3.msk.msra.mxu0 %vm123_vm1, %v1685_v19 }
  0x14   :  { %1492 = vmatprep.subr.bf16.mxu0 %v1589_v6  ;;  %1346 = vmatpush3.msk.msra.mxu1 %vm123_vm1, %v1685_v19 }
  0x15   :  { %1501 = vmatprep.subr.bf16.mxu1 %v1589_v6 }
  0x17   :  { %1569 = vset.pattern.permute.xlu1 %v1597_v21  ;;  %v28_v21 = vld [vmem:[%s2093_s5 + $0x20] sm:$0xff] }
  0x18   :  { %678 = vperm.xlu1 %1569, %v100_v3   ;;  %v25_v3 = vld [vmem:[%s2093_s5 + $0x8] sm:$0xff] }
  0x83   :  { %v114_v25 = vpop.permute.xlu0 %113  ;;  %v439_v26 = vpop.permute.xlu1 %438 }
  0x84   :  { %vm116_vm3 = vcmp.eq.f32.partialorder %v114_v25, %v1694_v24  ;;  %vm441_vm7 = vcmp.eq.f32.partialorder %v439_v26, %v1694_v24  ;;  %v853_v25 = vpack.c.bf16 %v29_v22, %v28_v21 }
  0x85   :  { %v1172_v27 = vsel %vm116_vm3, 1.0, %v1591_v11  ;;  %v1184_v35 = vsel %vm441_vm7, 1.0, %v1591_v11  ;;  %vm1161_vm3 = vcmask 7168  }
  0x86   :  { %1331 = vmatmul.mubr.msk.f32.vlgmr.msra.gmra.mrb[0].mxu0 %vm119_vm2, %v1172_v27  ;;  %v30_v27 = vld [vmem:[%s2093_s5 + $0x30] sm:$0xff] }
  0x87   :  { %1494 = vmatpush3.bf16.msra.mxu0 %v1648_v7  ;;  %1364 = vmatprep.mubr.msk.f32.mxu0 %vm1590_vm0, %v1591_v11 }
  0x88   :  { %v1702_v28 = vpop.permute.xlu1 %598  ;;  %1495 = vmatprep.subr.bf16.mxu0 %v1589_v6  ;;  %v279_v29 = vpop.permute.xlu0 %278 }
  0x89   :  { %vm281_vm5 = vcmp.eq.f32.partialorder %v279_v29, %v1694_v24  ;;  %vm601_vm9 = vcmp.eq.f32.partialorder %v1702_v28, %v1694_v24  ;;  %v31_v28 = vld [vmem:[%s2093_s5 + $0x38] sm:$0xff]  ;;  %v48_v29 = vld [vmem:[%s2093_s5 + $0xc0] sm:$0xff] }
  0x8a   :  { %v1178_v32 = vsel %vm281_vm5, 1.0, %v1591_v11  ;;  %v1190_v40 = vsel %vm601_vm9, 1.0, %v1591_v11 }
  0x8b   :  { %1497 = vmatpush3.bf16.msra.mxu0 %v1660_v10 }
  0x8c   :  { %1498 = vmatprep.subr.bf16.mxu0 %v1589_v6 }
  0x8d   :  { %v199_v30 = vpop.permute.xlu1 %198  ;;  %v359_v33 = vpop.permute.xlu0 %358 }
  0x8e   :  { %vm201_vm4 = vcmp.eq.f32.partialorder %v199_v30, %v1694_v24  ;;  %vm361_vm6 = vcmp.eq.f32.partialorder %v359_v33, %v1694_v24  ;;  %v49_v30 = vld [vmem:[%s2093_s5 + $0xc8] sm:$0xff]  ;;  %v32_v33 = vld [vmem:[%s2093_s5 + $0x40] sm:$0xff] }
  0x8f   :  { %v1175_v31 = vsel %vm201_vm4, 1.0, %v1591_v11  ;;  %1500 = vmatpush3.bf16.msra.mxu0 %v1676_v16  ;;  %v1181_v34 = vsel %vm361_vm6, 1.0, %v1591_v11  ;;  %vm1166_vm4 = vcmask 9216  }
  0x90   :  { %1348 = vmatmul.mubr.msk.f32.vlgmr.msra.gmra.mrb[0].mxu1 %vm119_vm2, %v1175_v31  ;;  %1362 = vmatprep.subr.mxu0 %v1591_v11  ;;  %v854_v31 = vpack.c.bf16 %v31_v28, %v30_v27  ;;  %v72_v27 = vld [vmem:[%s2093_s5 + $0x180] sm:$0xff]  ;;  %v73_v28 = vld [vmem:[%s2093_s5 + $0x188] sm:$0xff] }
  0x91   :  { %1503 = vmatpush3.bf16.msra.mxu1 %v1648_v7  ;;  %1381 = vmatprep.mubr.msk.f32.mxu1 %vm1590_vm0, %v1591_v11 }
  0x92   :  { %1504 = vmatprep.subr.bf16.mxu1 %v1589_v6  ;;  %v519_v36 = vpop.permute.xlu1 %518 }
  0x93   :  { %1363 = vmatpush3.msk.msra.mxu0 %vm123_vm1, %v1685_v19  ;;  %vm521_vm8 = vcmp.eq.f32.partialorder %v519_v36, %v1694_v24  ;;  %v51_v36 = vld [vmem:[%s2093_s5 + $0xd8] sm:$0xff] }
  0x94   :  { %1365 = vmatmul.mubr.msk.f32.vlgmr.msra.gmra.mrb[2].mxu0 %vm119_vm2, %v1178_v32  ;;  %1510 = vmatprep.subr.bf16.mxu0 %v1589_v6  ;;  %v1187_v37 = vsel %vm521_vm8, 1.0, %v1591_v11  ;;  %v863_v32 = vpack.c.bf16 %v49_v30, %v48_v29  ;;  %v56_v29 = vld [vmem:[%s2093_s5 + $0x100] sm:$0xff]  ;;  %v953_v30 = vpack.c.bf16 %v73_v28, %v72_v27  ;;  %v94_v27 = vld [vmem:[%s2091_s4 + $0x30] sm:$0xff]  ;;  %v95_v28 = vld [vmem:[%s2091_s4 + $0x38] sm:$0xff] }
  0x95   :  { %1506 = vmatpush3.bf16.msra.mxu1 %v1660_v10  ;;  %1512 = vmatpush3.bf16.msra.mxu0 %v1648_v7 }
  0x96   :  { %1507 = vmatprep.subr.bf16.mxu1 %v1589_v6  ;;  %1513 = vmatprep.subr.bf16.mxu0 %v1589_v6 }
  0x97   :  { %1398 = vmatprep.mubr.msk.f32.mxu0 %vm1590_vm0, %v1591_v11  ;;  %v679_v45 = vpop.permute.xlu1 %678 }
  0x98   :  { %vm681_vm10 = vcmp.eq.f32.partialorder %v679_v45, %v1694_v24  ;;  %v47_v24 = vld [vmem:[%s2093_s5 + $0xb8] sm:$0xff]  ;;  %v36_v45 = vld [vmem:[%s2093_s5 + $0x60] sm:$0xff] }
  0x99   :  { %1509 = vmatpush3.bf16.msra.mxu1 %v1676_v16  ;;  %1515 = vmatpush3.bf16.msra.mxu0 %v1660_v10  ;;  %v1193_v48 = vsel %vm681_vm10, 1.0, %v1591_v11  ;;  %v862_v26 = vpack.c.bf16 %v47_v24, %v46_v23 }
  0x9a   :  { %1379 = vmatprep.subr.mxu1 %v1591_v11  ;;  %1516 = vmatprep.subr.bf16.mxu0 %v1589_v6 }
  0x9d   :  { %1380 = vmatpush3.msk.msra.mxu1 %vm123_vm1, %v1685_v19  ;;  %1518 = vmatpush3.bf16.msra.mxu0 %v1676_v16 }
  0x9e   :  { %1519 = vmatprep.subr.bf16.mxu1 %v1589_v6  ;;  %1382 = vmatmul.mubr.msk.f32.vlgmr.msra.gmra.mrb[2].mxu1 %vm119_vm2, %v1181_v34  ;;  %v33_v34 = vld [vmem:[%s2093_s5 + $0x48] sm:$0xff] }
  0x9f   :  { %1521 = vmatpush3.bf16.msra.mxu1 %v1648_v7  ;;  %1396 = vmatprep.subr.mxu0 %v1591_v11 }
  0xa0   :  { %1522 = vmatprep.subr.bf16.mxu1 %v1589_v6  ;;  %1415 = vmatprep.mubr.msk.f32.mxu1 %vm1590_vm0, %v1591_v11 }
  0xa1   :  { %1397 = vmatpush3.msk.msra.mxu0 %vm123_vm1, %v1685_v19 }
  0xa2   :  { %1399 = vmatmul.mubr.msk.f32.vlgmr.msra.gmra.mrb[4].mxu0 %vm119_vm2, %v1184_v35  ;;  %1528 = vmatprep.subr.bf16.mxu0 %v1589_v6  ;;  %v50_v35 = vld [vmem:[%s2093_s5 + $0xd0] sm:$0xff] }
  0xa3   :  { %1524 = vmatpush3.bf16.msra.mxu1 %v1660_v10  ;;  %1530 = vmatpush3.bf16.msra.mxu0 %v1648_v7  ;;  %v864_v38 = vpack.c.bf16 %v51_v36, %v50_v35  ;;  %v58_v36 = vld [vmem:[%s2093_s5 + $0x110] sm:$0xff] }
  0xa4   :  { %1525 = vmatprep.subr.bf16.mxu1 %v1589_v6  ;;  %1531 = vmatprep.subr.bf16.mxu0 %v1589_v6 }
  0xa5   :  { %1432 = vmatprep.mubr.msk.f32.mxu0 %vm1590_vm0, %v1591_v11 }
  0xa7   :  { %1527 = vmatpush3.bf16.msra.mxu1 %v1676_v16  ;;  %1533 = vmatpush3.bf16.msra.mxu0 %v1660_v10 }
  0xa8   :  { %1413 = vmatprep.subr.mxu1 %v1591_v11  ;;  %1534 = vmatprep.subr.bf16.mxu0 %v1589_v6 }
  0xab   :  { %1414 = vmatpush3.msk.msra.mxu1 %vm123_vm1, %v1685_v19  ;;  %1536 = vmatpush3.bf16.msra.mxu0 %v1676_v16 }
  0xac   :  { %1416 = vmatmul.mubr.msk.f32.vlgmr.msra.gmra.mrb[4].mxu1 %vm119_vm2, %v1187_v37  ;;  %1537 = vmatprep.subr.bf16.mxu1 %v1589_v6  ;;  %v855_v37 = vpack.c.bf16 %v33_v34, %v32_v33  ;;  %v75_v33 = vld [vmem:[%s2093_s5 + $0x198] sm:$0xff] }
  0xad   :  { %1539 = vmatpush3.bf16.msra.mxu1 %v1648_v7  ;;  %1430 = vmatprep.subr.mxu0 %v1591_v11  ;;  %v851_v7 = vpack.c.bf16 %v25_v3, %v24_v1 }
  0xae   :  { %1540 = vmatprep.subr.bf16.mxu1 %v1589_v6  ;;  %1449 = vmatprep.mubr.msk.f32.mxu1 %vm1590_vm0, %v1591_v11 }
  0xaf   :  { %1431 = vmatpush3.msk.msra.mxu0 %vm123_vm1, %v1685_v19 }
  0xb0   :  { %1433 = vmatmul.mubr.msk.f32.vlgmr.msra.gmra.mrb[6].mxu0 %vm119_vm2, %v1190_v40  ;;  %1452 = vmatprep.subr.bf16.mxu0 %v1591_v11  ;;  %v35_v40 = vld [vmem:[%s2093_s5 + $0x58] sm:$0xff] }
  0xb1   :  { %1542 = vmatpush3.bf16.msra.mxu1 %v1660_v10  ;;  %1453 = vmatpush3.bf16.msra.mxu0 %v792_v41  ;;  %v27_v10 = vld [vmem:[%s2093_s5 + $0x18] sm:$0xff]  ;;  %v52_v41 = vld [vmem:[%s2093_s5 + $0xe0] sm:$0xff]  ;;  %v856_v43 = vpack.c.bf16 %v35_v40, %v34_v39  ;;  %v77_v39 = vld [vmem:[%s2093_s5 + $0x1a8] sm:$0xff] }
  0xb2   :  { %1543 = vmatprep.subr.bf16.mxu1 %v1589_v6  ;;  %1454 = vmatprep.subr.bf16.mxu0 %v1591_v11  ;;  %v852_v17 = vpack.c.bf16 %v27_v10, %v26_v9 }
  0xb3   :  { %1456 = vmatprep.mubr.msk.bf16.mxu0 %vm1590_vm0, %v1591_v11 }
  0xb5   :  { %1545 = vmatpush3.bf16.msra.mxu1 %v1676_v16  ;;  %1455 = vmatpush3.bf16.msra.mxu0 %v793_v44  ;;  %v865_v44 = vpack.c.bf16 %v53_v42, %v52_v41  ;;  %v60_v42 = vld [vmem:[%s2093_s5 + $0x120] sm:$0xff] }
  0xb6   :  { %1447 = vmatprep.subr.mxu1 %v1591_v11  ;;  %1289 = vmatprep.subr.bf16.mxu0 %v953_v30 }
  0xb8   :  { %1457 = vmatmul.mubr.msk.bf16.vlgmr.msra.gmra.mrb[8].mxu0 %vm781_vm11, %v791_v47  ;;  %v857_v47 = vpack.c.bf16 %v37_v46, %v36_v45  ;;  %v79_v45 = vld [vmem:[%s2093_s5 + $0x1b8] sm:$0xff] }
  0xb9   :  { %1448 = vmatpush3.msk.msra.mxu1 %vm123_vm1, %v1685_v19  ;;  %vm929_vm1 = vcmask 130048  }
  0xba   :  { %1450 = vmatmul.mubr.msk.f32.vlgmr.msra.gmra.mrb[6].mxu1 %vm119_vm2, %v1193_v48  ;;  %1267 = vmatprep.subr.bf16.mxu1 %v859_v2  ;;  %v54_v48 = vld [vmem:[%s2093_s5 + $0xf0] sm:$0xff]  ;;  %vm1109_vm2 = vcmask 254976  }
  0xbb   :  { %1268 = vmatpush3.bf16.msra.mxu1 %v851_v7 }
  0xbc   :  { %1269 = vmatprep.subr.bf16.mxu1 %v860_v8 }
  0xbf   :  { %1270 = vmatpush3.bf16.msra.mxu1 %v852_v17 }
  0xc0   :  { %1271 = vmatprep.subr.bf16.mxu1 %v861_v20 }
  0xc3   :  { %1272 = vmatpush3.bf16.msra.mxu1 %v853_v25 }
  0xc4   :  { %1273 = vmatprep.subr.bf16.mxu1 %v862_v26 }
  0xc7   :  { %1274 = vmatpush3.bf16.msra.mxu1 %v854_v31  ;;  %v57_v31 = vld [vmem:[%s2093_s5 + $0x108] sm:$0xff] }
  0xc8   :  { %1275 = vmatprep.subr.bf16.mxu1 %v863_v32  ;;  %v74_v32 = vld [vmem:[%s2093_s5 + $0x190] sm:$0xff]  ;;  %v945_v34 = vpack.c.bf16 %v57_v31, %v56_v29  ;;  %v1003_v29 = vpack.c.bf16 %v95_v28, %v94_v27 }
  0xc9   :  { %v954_v35 = vpack.c.bf16 %v75_v33, %v74_v32 }
  0xca   :  { %1290 = vmatpush3.bf16.msra.mxu0 %v945_v34 }
  0xcb   :  { %1276 = vmatpush3.bf16.msra.mxu1 %v855_v37  ;;  %v59_v37 = vld [vmem:[%s2093_s5 + $0x118] sm:$0xff]  ;;  %1291 = vmatprep.subr.bf16.mxu0 %v954_v35 }
  0xcc   :  { %1277 = vmatprep.subr.bf16.mxu1 %v864_v38  ;;  %v76_v38 = vld [vmem:[%s2093_s5 + $0x1a0] sm:$0xff]  ;;  %v946_v40 = vpack.c.bf16 %v59_v37, %v58_v36 }
  0xcd   :  { %v955_v41 = vpack.c.bf16 %v77_v39, %v76_v38 }
  0xce   :  { %1292 = vmatpush3.bf16.msra.mxu0 %v946_v40 }
  0xcf   :  { %1278 = vmatpush3.bf16.msra.mxu1 %v856_v43  ;;  %v61_v43 = vld [vmem:[%s2093_s5 + $0x128] sm:$0xff]  ;;  %1293 = vmatprep.subr.bf16.mxu0 %v955_v41 }
  0xd0   :  { %1279 = vmatprep.subr.bf16.mxu1 %v865_v44  ;;  %v78_v44 = vld [vmem:[%s2093_s5 + $0x1b0] sm:$0xff]  ;;  %v947_v46 = vpack.c.bf16 %v61_v43, %v60_v42 }
  0xd2   :  { %1294 = vmatpush3.bf16.msra.mxu0 %v947_v46  ;;  %v98_v46 = vld [vmem:[%s2091_s4 + $0x50] sm:$0xff] }
  0xd3   :  { %1280 = vmatpush3.bf16.msra.mxu1 %v857_v47  ;;  %v956_v47 = vpack.c.bf16 %v79_v45, %v78_v44  ;;  %v97_v45 = vld [vmem:[%s2091_s4 + $0x48] sm:$0xff] }
  0xd5   :  { %1295 = vmatprep.subr.bf16.mxu0 %v956_v47  ;;  %v1064_v47 = vpack.c.bf16 %v98_v46, %v97_v45 }
 0x159   :  { %v1807_v49 = vpop.f32.mrb[0].mxu0 }
 0x15a   :  { %v1332_v50 = vpop.f32.mrb[1].mxu0 }
 0x15b   :  { %v55_v50 = vld [vmem:[%s2093_s5 + $0xf8] sm:$0xff] }
 0x163   :  { %v273_v51 = vpop.f32.mrb[0].mxu1 }
 0x164   :  { %v1349_v52 = vpop.f32.mrb[1].mxu1 }
 0x165   :  { %v38_v52 = vld [vmem:[%s2093_s5 + $0x70] sm:$0xff] }
 0x167   :  { %v353_v53 = vpop.f32.mrb[2].mxu0 }
 0x168   :  { %v1366_v54 = vpop.f32.mrb[3].mxu0 }
 0x171   :  { %v433_v55 = vpop.f32.mrb[2].mxu1 }
 0x172   :  { %v1383_v56 = vpop.f32.mrb[3].mxu1 }
 0x175   :  { %v1809_v57 = vpop.f32.mrb[4].mxu0 }
 0x176   :  { %v1400_v58 = vpop.f32.mrb[5].mxu0 }
 0x17f   :  { %v593_v59 = vpop.f32.mrb[4].mxu1 }
 0x180   :  { %770 = vrot.lane.b32.xlu1 %v593_v59, %s1598_s1  ;;  %v1417_v60 = vpop.f32.mrb[5].mxu1 }
 0x183   :  { %v673_v61 = vpop.f32.mrb[6].mxu0 }
 0x184   :  { %v1434_v62 = vpop.f32.mrb[7].mxu0  ;;  %774 = vrot.lane.b32.xlu1 %v673_v61, %s1599_s21 }
 0x18b   :  { %v1831_v6 = vpop.f32.mrb[8].mxu0 }
 0x18c   :  { %838 = vrot.lane.b32.xlu0 %v1831_v6, %s1598_s1  ;;  %v1458_v13 = vpop.f32.mrb[9].mxu0 }
 0x18d   :  { %v753_v15 = vpop.f32.mrb[6].mxu1  ;;  %v834_v16 = vpop.f32.mrb[10].mxu0 }
 0x18e   :  { %v1459_v18 = vpop.f32.mrb[11].mxu0  ;;  %778 = vrot.lane.b32.xlu1 %v753_v15, %s1600_s16  ;;  %v1451_v19 = vpop.f32.mrb[7].mxu1 }
 0x190   :  { %758 = vrot.lane.b32.xlu0 %v273_v51, %s1598_s1  ;;  %v866_v51 = vpack.c.bf16 %v55_v50, %v54_v48  ;;  %v62_v48 = vld [vmem:[%s2093_s5 + $0x130] sm:$0xff]  ;;  %v63_v50 = vld [vmem:[%s2093_s5 + $0x138] sm:$0xff] }
 0x192   :  { %766 = vrot.lane.b32.xlu1 %v433_v55, %s1600_s16  ;;  %1281 = vmatprep.subr.bf16.mxu1 %v866_v51 }
 0x194   :  { %762 = vrot.lane.b32.xlu0 %v353_v53, %s1599_s21  ;;  %v39_v53 = vld [vmem:[%s2093_s5 + $0x78] sm:$0xff] }
 0x195   :  { %v858_v54 = vpack.c.bf16 %v39_v53, %v38_v52  ;;  %v80_v52 = vld [vmem:[%s2093_s5 + $0x1c0] sm:$0xff]  ;;  %v81_v53 = vld [vmem:[%s2093_s5 + $0x1c8] sm:$0xff] }
 0x197   :  { %1282 = vmatpush3.bf16.msra.mxu1 %v858_v54 }
 0x198   :  { %1460 = vmatprep.subr.bf16.mxu1 %v1591_v11 }
 0x1f2   :  { %v771_v58 = vpop.permute.xlu1 %770 }
 0x1f3   :  { %v787_v2 = vsel %vm781_vm11, %v1809_v57, %v771_v58  ;;  %v64_v58 = vld [vmem:[%s2093_s5 + $0x140] sm:$0xff] }
 0x1f6   :  { %v775_v60 = vpop.permute.xlu1 %774 }
 0x1f7   :  { %v788_v3 = vsel %vm783_vm12, %v787_v2, %v775_v60  ;;  %v82_v60 = vld [vmem:[%s2093_s5 + $0x1d0] sm:$0xff]  ;;  %v84_v2 = vld [vmem:[%s2093_s5 + $0x1e0] sm:$0xff] }
 0x1fe   :  { %v839_v55 = vpop.permute.xlu0 %838 }
 0x1ff   :  { %v841_v56 = vsel %vm781_vm11, %v1831_v6, %v839_v55  ;;  %v948_v55 = vpack.c.bf16 %v63_v50, %v62_v48  ;;  %v1127_v48 = vld [vmem:[%s2094_s2] sm:$0x3] }
 0x200   :  { %843 = vrot.lane.b32.xlu0 %v841_v56, %s1599_s21  ;;  %v779_v61 = vpop.permute.xlu1 %778  ;;  %v1128_v50 = vmul.f32 %v1127_v48, %v1127_v48 }
 0x201   :  { %v1927_v5 = vsel %vm785_vm13, %v788_v3, %v779_v61  ;;  %v83_v61 = vld [vmem:[%s2093_s5 + $0x1d8] sm:$0xff]  ;;  %1296 = vmatpush3.bf16.msra.mxu0 %v948_v55  ;;  %v85_v3 = vld [vmem:[%s2093_s5 + $0x1e8] sm:$0xff] }
 0x202   :  { %v759_v59 = vpop.permute.xlu0 %758  ;;  %v1129_v55 = vsel %vm1109_vm2, %v1128_v50, 0.0 }
 0x203   :  { %v782_v63 = vsel %vm781_vm11, %v1807_v49, %v759_v59  ;;  %v65_v59 = vld [vmem:[%s2093_s5 + $0x148] sm:$0xff] }
 0x204   :  { %v767_v1 = vpop.permute.xlu1 %766 }
 0x206   :  { %v763_v62 = vpop.permute.xlu0 %762 }
 0x207   :  { %v784_v0 = vsel %vm783_vm12, %v782_v63, %v763_v62  ;;  %v949_v62 = vpack.c.bf16 %v65_v59, %v64_v58  ;;  %v958_v63 = vpack.c.bf16 %v83_v61, %v82_v60 }
 0x208   :  { %v1929_v6 = vsel %vm785_vm13, %v784_v0, %v767_v1  ;;  %v66_v0 = vld [vmem:[%s2093_s5 + $0x150] sm:$0xff]  ;;  %v67_v1 = vld [vmem:[%s2093_s5 + $0x158] sm:$0xff] }
 0x272   :  { %v844_v4 = vpop.permute.xlu0 %843 }
 0x273   :  { %v846_v7 = vsel %vm783_vm12, %v841_v56, %v844_v4  ;;  %v957_v56 = vpack.c.bf16 %v81_v53, %v80_v52  ;;  %v950_v4 = vpack.c.bf16 %v67_v1, %v66_v0 }
 0x274   :  { %v847_v8 = vmul.f32 %v846_v7, %v1929_v6  ;;  %v848_v49 = vmul.f32 %v846_v7, %v1927_v5  ;;  %v959_v7 = vpack.c.bf16 %v85_v3, %v84_v2 }
 0x275   :  { %1297 = vmatprep.subr.bf16.mxu0 %v957_v56 }
 0x276   :  { %v849_v9 = vpack.c.bf16 %v847_v8, %v847_v8  ;;  %v850_v10 = vpack.c.bf16 %v848_v49, %v848_v49  ;;  %1298 = vmatpush3.bf16.msra.mxu0 %v949_v62  ;;  %v68_v8 = vld [vmem:[%s2093_s5 + $0x160] sm:$0xff]  ;;  %v69_v49 = vld [vmem:[%s2093_s5 + $0x168] sm:$0xff] }
 0x277   :  { %1299 = vmatprep.subr.bf16.mxu0 %v958_v63 }
 0x278   :  { %899 = vmatprep.mubr.bf16.mxu1 %v850_v10  ;;  %v86_v10 = vld [vmem:[%s2093_s5 + $0x1f0] sm:$0xff] }
 0x279   :  { %900 = vmatmul.mubr.bf16.vlgmr.msra.gmra.mrb[8].mxu1 %v849_v9  ;;  %v951_v9 = vpack.c.bf16 %v69_v49, %v68_v8 }
 0x27a   :  { %1464 = vmatprep.mubr.msk.bf16.mxu1 %vm1590_vm0, %v1591_v11  ;;  %1300 = vmatpush3.bf16.msra.mxu0 %v950_v4 }
 0x27b   :  { %1301 = vmatprep.subr.bf16.mxu0 %v959_v7 }
 0x27e   :  { %1302 = vmatpush3.bf16.msra.mxu0 %v951_v9 }
 0x34c   :  { %v1283_v57 = vpop.f32.mrb[8].mxu1 }
 0x34d   :  { %v1284_v12 = vpop.f32.mrb[9].mxu1 }
 0x34e   :  { %v1285_v13 = vadd.f32 %v1284_v12, %v1283_v57  ;;  %v1286_v14 = vpop.f32.mrb[10].mxu1  ;;  %v87_v57 = vld [vmem:[%s2093_s5 + $0x1f8] sm:$0xff] }
 0x34f   :  { %v1287_v15 = vpop.f32.mrb[11].mxu1  ;;  %v960_v12 = vpack.c.bf16 %v87_v57, %v86_v10  ;;  %v71_v14 = vld [vmem:[%s2093_s5 + $0x178] sm:$0xff] }
 0x350   :  { %v908_v16 = vsel %vm907_vm14, %v1285_v13, -inf }
 0x351   :  { %909 = vmax.xlane.f32.xlu0 %v908_v16  ;;  %1303 = vmatprep.subr.bf16.mxu0 %v960_v12  ;;  %v92_v16 = vld [vmem:[%s2091_s4 + $0x20] sm:$0xff] }
 0x3de   :  { %v910_v17 = vpop.xlane.xlu0 %909 }
 0x3df   :  { %v911_v18 = vsub.f32 %v1285_v13, %v910_v17  ;;  %v70_v13 = vld [vmem:[%s2093_s5 + $0x170] sm:$0xff]  ;;  %v93_v17 = vld [vmem:[%s2091_s4 + $0x28] sm:$0xff] }
 0x3e0   :  { %v952_v15 = vpack.c.bf16 %v71_v14, %v70_v13 }
 0x3e1   :  { %v912_v19 = vmul.f32 1.442695, %v911_v18  ;;  %v1002_v18 = vpack.c.bf16 %v93_v17, %v92_v16 }
 0x3e2   :  { %1304 = vmatpush3.bf16.msra.mxu0 %v952_v15 }
 0x3e3   :  { %1571 = vpow2.f32 %v912_v19  ;;  %1468 = vmatprep.subr.bf16.mxu0 %v1591_v11  ;;  %1461 = vmatpush3.bf16.msra.mxu1 %v1002_v18 }
 0x3e4   :  { %1462 = vmatprep.subr.bf16.mxu1 %v1591_v11 }
 0x3e7   :  { %1463 = vmatpush3.bf16.msra.mxu1 %v1003_v29 }
 0x3ed   :  { %v1572_v20 = vpop.eup %1571 }
 0x3ee   :  { %v914_v21 = vsel %vm907_vm14, %v1572_v20, 0.0 }
 0x3ef   :  { %915 = vadd.xlane.f32.xlu1 %v914_v21 }
 0x47c   :  { %v916_v22 = vpop.xlane.xlu1 %915 }
 0x47d   :  { %1573 = vrcp.f32 %v916_v22 }
 0x487   :  { %v1574_v23 = vpop.eup %1573 }
 0x488   :  { %v918_v24 = vmul.f32 %v1574_v23, %v1572_v20 }
 0x48a   :  { %920 = vrot.lane.b32.xlu0 %v918_v24, %s1601_s12 }
 0x4fc   :  { %v921_v25 = vpop.permute.xlu0 %920 }
 0x4fd   :  { %v924_v26 = vsel %vm923_vm15, %v918_v24, %v921_v25 }
 0x4fe   :  { %926 = vrot.lane.b32.xlu1 %v924_v26, %s1602_s13 }
 0x570   :  { %v927_v51 = vpop.permute.xlu1 %926 }
 0x571   :  { %v930_v54 = vsel %vm929_vm1, %v924_v26, %v927_v51 }
 0x572   :  { %932 = vrot.lane.b32.xlu0 %v930_v54, %s1598_s1 }
 0x5e4   :  { %v933_v19 = vpop.permute.xlu0 %932 }
 0x5e5   :  { %v935_v20 = vsel %vm781_vm11, %v930_v54, %v933_v19 }
 0x5e6   :  { %937 = vrot.lane.b32.xlu1 %v935_v20, %s1599_s21 }
 0x658   :  { %v938_v21 = vpop.permute.xlu1 %937 }
 0x659   :  { %v940_v22 = vsel %vm783_vm12, %v935_v20, %v938_v21 }
 0x65a   :  { %v941_v23 = vmul.f32 %v940_v22, %v1929_v6  ;;  %v942_v24 = vmul.f32 %v940_v22, %v1927_v5 }
 0x65c   :  { %v943_v25 = vpack.c.bf16 %v941_v23, %v941_v23  ;;  %v944_v26 = vpack.c.bf16 %v942_v24, %v942_v24 }
 0x65e   :  { %993 = vmatprep.mubr.bf16.mxu0 %v944_v26 }
 0x65f   :  { %994 = vmatmul.mubr.bf16.vlgmr.msra.gmra.mrb[12].mxu0 %v943_v25 }
 0x660   :  { %1470 = vmatprep.mubr.msk.bf16.mxu0 %vm1590_vm0, %v1591_v11  ;;  %v1197_v11 = vld [vmem:[%s2091_s4 + $0x40] ss:$0 sm:$0xff]  ;;  %vm1051_vm0 = vcmask 123904   ;;  %1469 = vmatpush3.bf16.msra.mxu0 %v1064_v47 }
 0x732   :  { %v1305_v6 = vpop.f32.mrb[12].mxu0 }
 0x733   :  { %v1306_v30 = vpop.f32.mrb[13].mxu0 }
 0x734   :  { %v2055_v5 = vadd.f32 %v1306_v30, %v1305_v6  ;;  %v1308_v31 = vpop.f32.mrb[14].mxu0 }
 0x735   :  { %v1309_v32 = vpop.f32.mrb[15].mxu0 }
 0x736   :  { %v1001_v33 = vpack.c.bf16 %v2055_v5, %v2055_v5  ;;  %v1116_v9 = vmul.f32 %v2055_v5, %v2055_v5 }
 0x738   :  { %1465 = vmatmul.mubr.msk.bf16.vlgmr.msra.gmra.mrb[12].mxu1 %vm781_vm11, %v1001_v33  ;;  %v1117_v57 = vsel %vm1109_vm2, %v1116_v9, 0.0 }
 0x80b   :  { %v1045_v34 = vpop.f32.mrb[12].mxu1 }
 0x80c   :  { %v1046_v35 = vadd.f32 %v1197_v11, %v1045_v34  ;;  %v1466_v36 = vpop.f32.mrb[13].mxu1 }
 0x80d   :  { %v1048_v37 = vpop.f32.mrb[14].mxu1 }
 0x80e   :  { %v1467_v38 = vpop.f32.mrb[15].mxu1  ;;  %v1052_v39 = vsel %vm1051_vm0, %v1046_v35, -inf }
 0x80f   :  { %1053 = vmax.xlane.f32.xlu0 %v1052_v39 }
 0x825   :  { %1140 = vrot.lane.b32.xlu0 %v1128_v50, %s1600_s16 }
 0x844   :  { %1130 = vadd.xlane.f32.xlu0 %v1129_v55 }
 0x89c   :  { %v1054_v40 = vpop.xlane.xlu0 %1053 }
 0x89d   :  { %v1055_v41 = vsub.f32 %v1046_v35, %v1054_v40 }
 0x89f   :  { %v1056_v42 = vmul.f32 1.442695, %v1055_v41 }
 0x8a0   :  { %v1141_v61 = vpop.permute.xlu0 %1140 }
 0x8a1   :  { %1575 = vpow2.f32 %v1056_v42  ;;  %v1143_v0 = vsel %vm1109_vm2, %v1141_v61, 0.0 }
 0x8ab   :  { %v1576_v43 = vpop.eup %1575 }
 0x8ac   :  { %v1058_v44 = vsel %vm1051_vm0, %v1576_v43, 0.0 }
 0x8ad   :  { %1059 = vadd.xlane.f32.xlu1 %v1058_v44 }
 0x8d1   :  { %v1131_v7 = vpop.xlane.xlu0 %1130 }
 0x8d2   :  { %v1132_v8 = vmax.f32 %v1131_v7, 1e-24 }
 0x93a   :  { %v1060_v51 = vpop.xlane.xlu1 %1059 }
 0x93b   :  { %1577 = vrcp.f32 %v1060_v51 }
 0x945   :  { %v1578_v52 = vpop.eup %1577 }
 0x946   :  { %v1062_v53 = vmul.f32 %v1578_v52, %v1576_v43 }
 0x948   :  { %v1063_v54 = vpack.c.bf16 %v1062_v53, %v1062_v53 }
 0x94a   :  { %1471 = vmatmul.mubr.msk.bf16.vlgmr.msra.gmra.mrb[16].mxu0 %vm929_vm1, %v1063_v54 }
 0xa1d   :  { %v1102_v56 = vpop.f32.mrb[16].mxu0 }
 0xa1e   :  { %v1108_v58 = vmul.f32 %v1102_v56, %v1102_v56  ;;  %v1472_v59 = vpop.f32.mrb[17].mxu0 }
 0xa1f   :  { %v1105_v60 = vpop.f32.mrb[18].mxu0 }
 0xa20   :  { %v1473_v62 = vpop.f32.mrb[19].mxu0  ;;  %v1110_v63 = vsel %vm1109_vm2, %v1108_v58, 0.0 }
 0xa21   :  { %1111 = vadd.xlane.f32.xlu1 %v1110_v63 }
 0xa25   :  { %1144 = vadd.xlane.f32.xlu1 %v1143_v0 }
 0xaae   :  { %v1112_v1 = vpop.xlane.xlu1 %1111 }
 0xaaf   :  { %v1113_v2 = vmax.f32 %v1112_v1, 1e-24 }
 0xab1   :  { %1579 = vrsqrt.f32 %v1113_v2 }
 0xab2   :  { %1581 = vrsqrt.f32 %v1132_v8  ;;  %v1145_v14 = vpop.xlane.xlu1 %1144 }
 0xab3   :  { %v1146_v15 = vmax.f32 %v1145_v14, 1e-24 }
 0xab5   :  { %1583 = vrsqrt.f32 %v1146_v15 }
 0xabb   :  { %v1580_v3 = vpop.eup %1579 }
 0xabc   :  { %v1115_v4 = vmul.f32 %v1580_v3, %v1102_v56  ;;  %v1582_v49 = vpop.eup %1581 }
 0xabd   :  { %v1134_v10 = vmul.f32 %v1582_v49, %v1127_v48 }
 0xabe   :  { %1150 = vrot.lane.b32.xlu1 %v1115_v4, %s1598_s1 }
 0xabf   :  { %v1135_v12 = vmul.f32 %v1134_v10, %v1115_v4  ;;  %v1584_v16 = vpop.eup %1583 }
 0xac0   :  { %v1148_v17 = vmul.f32 %v1584_v16, %v1127_v48 }
 0xac1   :  { %v1136_v13 = vsel %vm1109_vm2, %v1135_v12, 0.0 }
 0xae2   :  { %1118 = vadd.xlane.f32.xlu1 %v1117_v57 }
 0xae6   :  { %1137 = vadd.xlane.f32.xlu1 %v1136_v13 }
 0xb30   :  { %v1151_v18 = vpop.permute.xlu1 %1150 }
 0xb31   :  { %v1153_v19 = vmul.f32 %v1151_v18, %v1148_v17 }
 0xb33   :  { %1155 = vrot.lane.b32.xlu0 %v1153_v19, %s1600_s16 }
 0xb6f   :  { %v1119_v20 = vpop.xlane.xlu1 %1118 }
 0xb70   :  { %v1120_v21 = vmax.f32 %v1119_v20, 1e-24 }
 0xb72   :  { %1585 = vrsqrt.f32 %v1120_v21 }
 0xb73   :  { %v1138_v28 = vpop.xlane.xlu1 %1137 }
 0xb7c   :  { %v1586_v22 = vpop.eup %1585 }
 0xb7d   :  { %v1122_v23 = vmul.f32 %v1586_v22, %v2055_v5 }
 0xb7f   :  { %v1123_v26 = vmul.f32 %v1122_v23, %v1115_v4 }
 0xb81   :  { %v1124_v27 = vsel %vm1109_vm2, %v1123_v26, 0.0 }
 0xba5   :  { %v1156_v24 = vpop.permute.xlu0 %1155 }
 0xba6   :  { %v1158_v25 = vsel %vm1109_vm2, %v1156_v24, 0.0 }
 0xba7   :  { %1159 = vadd.xlane.f32.xlu1 %v1158_v25 }
 0xbab   :  { %1125 = vadd.xlane.f32.xlu1 %v1124_v27 }
 0xc34   :  { %v1160_v29 = vpop.xlane.xlu1 %1159 }
 0xc35   :  { %v1162_v6 = vsel %vm1161_vm3, %v1138_v28, %v1160_v29 }
 0xc38   :  { %v1126_v30 = vpop.xlane.xlu1 %1125 }
 0xc39   :  { %v1163_v31 = vsub.f32 %v1162_v6, %v1126_v30 }
 0xc3b   :  { %v1164_v32 = vadd.f32 1.0, %v1163_v31 }
 0xc3d   :  { %v1165_v33 = vmax.f32 %v1164_v32, 0.0 }
 0xc3f   :  { %1167 = vst.msk [vmem:[%s2095_s6] sm:$0x3] %vm1166_vm4, %v1165_v33 }

</bundles_post_ra>
